<compile_context>
chip_gen: v6e
topology: v6e:2x2x1
jax: 0.10.0
libtpu: 0.0.40
codegen_flags: <defaults>
</compile_context>

<pallas_src>
import functools

import jax
import jax.numpy as jnp
from jax.experimental import pallas as pl
from jax.experimental.pallas import tpu as pltpu

M_POS = 0.9
M_NEG = 0.1
ALPHA = 0.5


def _margin_loss_kernel(lengths_ref, labels_ref, out_ref, acc_ref, *, inv_count):
    # Zero the vector accumulator on the first grid step.
    @pl.when(pl.program_id(0) == 0)
    def _init():
        acc_ref[...] = jnp.zeros_like(acc_ref)

    lengths = lengths_ref[...].astype(jnp.float32)
    labels = labels_ref[...].astype(jnp.float32)

    left = jnp.maximum(M_POS - lengths, 0.0)
    left = left * left
    right = jnp.maximum(lengths - M_NEG, 0.0)
    right = right * right

    # labels*left + ALPHA*(1-labels)*right == a_r + labels*(left - a_r)
    a_r = ALPHA * right
    margin = a_r + labels * (left - a_r)

    # Pure VPU adds per step; no per-step cross-lane reduce, no SMEM scalar RMW.
    acc_ref[...] += margin

    # Single reduce + scaled store on the last grid step.
    @pl.when(pl.program_id(0) == pl.num_programs(0) - 1)
    def _finalize():
        out_ref[...] = jnp.sum(acc_ref[...], keepdims=True) * inv_count


def _round_up(x: int, m: int) -> int:
    return ((x + m - 1) // m) * m


def margin_loss(lengths: jax.Array, labels: jax.Array,
                *, max_tile_rows: int = 1024,
                vmem_budget_bytes: int = 8 * 1024 * 1024) -> jax.Array:
    """Mean margin loss over a [batch, num_classes] lengths/labels pair."""
    assert lengths.shape == labels.shape
    assert lengths.ndim == 2
    B, C = lengths.shape
    inv_count = 1.0 / float(B * C)  # true element count, hoisted out of kernel

    # Pick the largest tile that fits the VMEM budget:
    #   2 double-buffered input tiles (+ the f32 accumulator) per row.
    in_bytes = jnp.dtype(lengths.dtype).itemsize + jnp.dtype(labels.dtype).itemsize
    bytes_per_row = C * (2 * in_bytes + 4)
    rows_fit = max(8, vmem_budget_bytes // max(bytes_per_row, 1))
    tile_rows = int(min(max_tile_rows, rows_fit))
    tile_rows = max(8, (tile_rows // 8) * 8)

    # Small inputs: a single grid step covering the whole (padded) batch.
    if B <= tile_rows:
        tile_rows = _round_up(B, 8)

    # Zero-pad the batch so it divides evenly; padded rows contribute 0 to the
    # sum, and the hoisted 1/(B*C) divisor keeps the mean exact.
    B_pad = _round_up(B, tile_rows)
    if B_pad != B:
        pad = ((0, B_pad - B), (0, 0))
        lengths = jnp.pad(lengths, pad)
        labels = jnp.pad(labels, pad)

    grid = (B_pad // tile_rows,)
    kernel = functools.partial(_margin_loss_kernel, inv_count=inv_count)

    out = pl.pallas_call(
        kernel,
        out_shape=jax.ShapeDtypeStruct((1, 1), jnp.float32),
        grid_spec=pltpu.PrefetchScalarGridSpec(
            num_scalar_prefetch=0,
            grid=grid,
            in_specs=[
                pl.BlockSpec((tile_rows, C), lambda i: (i, 0)),
                pl.BlockSpec((tile_rows, C), lambda i: (i, 0)),
            ],
            out_specs=pl.BlockSpec((1, 1), lambda i: (0, 0)),
            scratch_shapes=[pltpu.VMEM((tile_rows, C), jnp.float32)],
        ),
        compiler_params=pltpu.CompilerParams(
            dimension_semantics=("arbitrary",)),
    )(lengths, labels)
    return out[0, 0]


def _reference(lengths, labels):
    lengths = lengths.astype(jnp.float32)
    labels = labels.astype(jnp.float32)
    left = jnp.maximum(M_POS - lengths, 0.0) ** 2
    right = jnp.maximum(lengths - M_NEG, 0.0) ** 2
    return jnp.mean(labels * left + ALPHA * (1.0 - labels) * right)


if __name__ == "__main__":
    key = jax.random.PRNGKey(0)
    k1, k2, k3, k4 = jax.random.split(key, 4)

    # Case 1: capsule-style one-hot labels, small demo shape (single grid step).
    B, C = 16, 128
    lengths = jax.random.uniform(k1, (B, C), dtype=jnp.float32)
    labels = jax.nn.one_hot(jax.random.randint(k2, (B,), 0, C), C,
                            dtype=jnp.float32)
    loss = jax.block_until_ready(margin_loss(lengths, labels))
    ref = _reference(lengths, labels)
    assert jnp.allclose(loss, ref, rtol=1e-5, atol=1e-6), (loss, ref)

    # Case 2: ragged batch + narrow class dim (exercises the zero-padding path).
    B2, C2 = 50, 10
    l2 = jax.random.uniform(k3, (B2, C2), dtype=jnp.float32)
    y2 = jax.nn.one_hot(jax.random.randint(k4, (B2,), 0, C2), C2,
                        dtype=jnp.float32)
    loss2 = jax.block_until_ready(margin_loss(l2, y2))
    ref2 = _reference(l2, y2)
    assert jnp.allclose(loss2, ref2, rtol=1e-5, atol=1e-6), (loss2, ref2)

    # Case 3: multi-step grid with bf16 inputs (force small tiles to exercise
    # the accumulator across grid steps).
    B3, C3 = 256, 128
    l3 = jax.random.uniform(k1, (B3, C3), dtype=jnp.float32)
    y3 = jax.nn.one_hot(jax.random.randint(k2, (B3,), 0, C3), C3,
                        dtype=jnp.float32)
    loss3 = jax.block_until_ready(
        margin_loss(l3.astype(jnp.bfloat16), y3.astype(jnp.bfloat16),
                    max_tile_rows=64))
    ref3 = _reference(l3, y3)
    assert jnp.allclose(loss3, ref3, rtol=2e-2, atol=2e-3), (loss3, ref3)

    print("KERNEL_OK")
</pallas_src>

<mosaic_0001>
module attributes {stable_mosaic.version = 11 : i64} {
  func.func @_margin_loss_kernel(%arg0: i32, %arg1: memref<16x128xf32, #tpu.memory_space<vmem>>, %arg2: memref<16x128xf32, #tpu.memory_space<vmem>>, %arg3: memref<1x1xf32, #tpu.memory_space<vmem>>, %arg4: memref<16x128xf32, #tpu.memory_space<vmem>>) attributes {dimension_semantics = [#tpu.dimension_semantics<arbitrary>], iteration_bounds = array<i64: 1>, scalar_prefetch = 0 : i64, scratch_operands = 1 : i64, tpu.core_type = #tpu.core_type<tc>, window_params = [{transform_indices = @transform_0, window_bounds = array<i64: 16, 128>}, {transform_indices = @transform_1, window_bounds = array<i64: 16, 128>}, {pipeline_mode = #tpu.pipeline_mode<synchronous>, transform_indices = @transform_2, window_bounds = array<i64: 1, 1>}]} {
    %c0_i32 = arith.constant 0 : i32
    %0 = arith.cmpi eq, %arg0, %c0_i32 : i32
    %1 = arith.extui %0 : i1 to i32
    %c0_i32_0 = arith.constant 0 : i32
    %2 = arith.cmpi ne, %1, %c0_i32_0 : i32
    scf.if %2 {
      %cst_14 = arith.constant 0.000000e+00 : f32
      %26 = vector.broadcast %cst_14 : f32 to vector<16x128xf32>
      %c0_15 = arith.constant 0 : index
      %c0_16 = arith.constant 0 : index
      %27 = vector.load %arg4[%c0_15, %c0_16] : memref<16x128xf32, #tpu.memory_space<vmem>>, vector<16x128xf32>
      tpu.vector_store %arg4[%c0_15, %c0_16], %26 {strides = array<i32>} : memref<16x128xf32, #tpu.memory_space<vmem>>, vector<16x128xf32>,
    } else {
    }
    %c0 = arith.constant 0 : index
    %c0_1 = arith.constant 0 : index
    %3 = vector.load %arg1[%c0, %c0_1] : memref<16x128xf32, #tpu.memory_space<vmem>>, vector<16x128xf32>
    %c0_2 = arith.constant 0 : index
    %c0_3 = arith.constant 0 : index
    %4 = vector.load %arg2[%c0_2, %c0_3] : memref<16x128xf32, #tpu.memory_space<vmem>>, vector<16x128xf32>
    %cst = arith.constant 0.899999976 : f32
    %5 = vector.broadcast %cst : f32 to vector<16x128xf32>
    %6 = arith.subf %5, %3 : vector<16x128xf32>
    %cst_4 = arith.constant 0.000000e+00 : f32
    %7 = vector.broadcast %cst_4 : f32 to vector<16x128xf32>
    %8 = arith.maximumf %6, %7 : vector<16x128xf32>
    %9 = arith.mulf %8, %8 : vector<16x128xf32>
    %cst_5 = arith.constant 1.000000e-01 : f32
    %10 = vector.broadcast %cst_5 : f32 to vector<16x128xf32>
    %11 = arith.subf %3, %10 : vector<16x128xf32>
    %cst_6 = arith.constant 0.000000e+00 : f32
    %12 = vector.broadcast %cst_6 : f32 to vector<16x128xf32>
    %13 = arith.maximumf %11, %12 : vector<16x128xf32>
    %14 = arith.mulf %13, %13 : vector<16x128xf32>
    %cst_7 = arith.constant 5.000000e-01 : f32
    %15 = vector.broadcast %cst_7 : f32 to vector<16x128xf32>
    %16 = arith.mulf %15, %14 : vector<16x128xf32>
    %17 = arith.subf %9, %16 : vector<16x128xf32>
    %18 = arith.mulf %4, %17 : vector<16x128xf32>
    %19 = arith.addf %16, %18 : vector<16x128xf32>
    %c0_8 = arith.constant 0 : index
    %c0_9 = arith.constant 0 : index
    %20 = vector.load %arg4[%c0_8, %c0_9] : memref<16x128xf32, #tpu.memory_space<vmem>>, vector<16x128xf32>
    %21 = arith.addf %20, %19 : vector<16x128xf32>
    %c0_10 = arith.constant 0 : index
    %c0_11 = arith.constant 0 : index
    %22 = vector.load %arg4[%c0_10, %c0_11] : memref<16x128xf32, #tpu.memory_space<vmem>>, vector<16x128xf32>
    tpu.vector_store %arg4[%c0_10, %c0_11], %21 {strides = array<i32>} : memref<16x128xf32, #tpu.memory_space<vmem>>, vector<16x128xf32>,
    %c0_i32_12 = arith.constant 0 : i32
    %23 = arith.cmpi eq, %arg0, %c0_i32_12 : i32
    %24 = arith.extui %23 : i1 to i32
    %c0_i32_13 = arith.constant 0 : i32
    %25 = arith.cmpi ne, %24, %c0_i32_13 : i32
    scf.if %25 {
      %c0_14 = arith.constant 0 : index
      %c0_15 = arith.constant 0 : index
      %26 = vector.load %arg4[%c0_14, %c0_15] : memref<16x128xf32, #tpu.memory_space<vmem>>, vector<16x128xf32>
      %27 = vector.shape_cast %26 : vector<16x128xf32> to vector<1x16x128xf32>
      %cst_16 = arith.constant dense<0.000000e+00> : vector<1xf32>
      %28 = vector.multi_reduction <add>, %27, %cst_16 [1, 2] : vector<1x16x128xf32> to vector<1xf32>
      %29 = vector.shape_cast %28 : vector<1xf32> to vector<1x1x1xf32>
      %30 = vector.extract %29[0, 0, 0] : f32 from vector<1x1x1xf32>
      %31 = vector.broadcast %30 : f32 to vector<1x1xf32>
      %cst_17 = arith.constant 4.8828125E-4 : f32
      %32 = vector.broadcast %cst_17 : f32 to vector<1x1xf32>
      %33 = arith.mulf %31, %32 : vector<1x1xf32>
      %c0_18 = arith.constant 0 : index
      %c0_19 = arith.constant 0 : index
      %34 = vector.load %arg3[%c0_18, %c0_19] : memref<1x1xf32, #tpu.memory_space<vmem>>, vector<1x1xf32>
      tpu.vector_store %arg3[%c0_18, %c0_19], %33 {strides = array<i32>} : memref<1x1xf32, #tpu.memory_space<vmem>>, vector<1x1xf32>,
    } else {
    }
    return
  }
  func.func @transform_0(%arg0: i32) -> (i32, i32) {
    %c0_i32 = arith.constant 0 : i32
    %c0_i32_0 = arith.constant 0 : i32
    return %arg0, %c0_i32 : i32, i32
  }
  func.func @transform_1(%arg0: i32) -> (i32, i32) {
    %c0_i32 = arith.constant 0 : i32
    %c0_i32_0 = arith.constant 0 : i32
    return %arg0, %c0_i32 : i32, i32
  }
  func.func @transform_2(%arg0: i32) -> (i32, i32) {
    %c0_i32 = arith.constant 0 : i32
    %c0_i32_0 = arith.constant 0 : i32
    %c0_i32_1 = arith.constant 0 : i32
    return %c0_i32, %c0_i32_0 : i32, i32
  }
}

</mosaic_0001>

<bundles_post_ra>
// kernel: tpu_custom_call.1
= control target key start
LH: loop header
LB: loop body
LE: loop exit
PB: predicated region body
PF: predicated region fallthrough
CT: control target
= control target key end

     0   :  { %7 = vsyncpa [#allocation4], 0  ;;  %s215_s0 = inlined_call_operand.hbm [shape: f32[16,128], index: 0, kind: input, shape index: {}]   ;;  %s216_s1 = inlined_call_operand.hbm [shape: f32[16,128], index: 1, kind: input, shape index: {}]   ;;  %s217_s2 = inlined_call_operand.hbm [shape: f32[1,1], index: 2, kind: output, shape index: {}]  }
   0x1   :  { %8 = vsyncpa [#allocation7], 0 }
   0x2   :  { %9 = vsyncpa [#allocation5], 0  ;;  %s186_s9 = smov [#allocation3]  }
   0x3   :  { %s15_s10 = sshll.u32 %s186_s9, 4  ;;  %s16_s10 = int_to_ptr.vmem [resolvable:$true] %s15_s10 }
   0x4   :  { %s128_s11 = scalar_lea.vmem %s16_s10, 256  ;;  %p133_p1 = scmp.lt.s32.totalorder %s16_s10, %s16_s10 }
   0x5   :  { %p129_p0 = scmp.ne.s32.totalorder %s16_s10, %s128_s11  ;;  %p134_p2 = scmp.lt.s32.totalorder %s128_s11, %s128_s11 }
   0x7   :  { %p135_p3 = por %p134_p2, %p133_p1 }
   0x9   :  { %p136_p4 = pnand %p135_p3, %p129_p0 }
   0xb   :  { %139 = shalt.err (!%p136_p4)
}
   0xc   :  { %s187_s12 = smov 128   ;;  %s188_s13 = smov 8  }
   0xd   :  { %21 = dma.hbm_to_vmem [thread:$0]  %s215_s0, 256, %s16_s10, [#allocation4], %s187_s12, %s187_s12, %s188_s13  }
   0xe   :  { %s189_s16 = smov [#allocation6]  }
   0xf   :  { %s27_s17 = sshll.u32 %s189_s16, 4  ;;  %s28_s17 = int_to_ptr.vmem [resolvable:$true] %s27_s17 }
  0x10   :  { %s148_s18 = scalar_lea.vmem %s28_s17, 256  ;;  %p153_p6 = scmp.lt.s32.totalorder %s28_s17, %s28_s17 }
  0x11   :  { %p149_p5 = scmp.ne.s32.totalorder %s28_s17, %s148_s18  ;;  %p154_p7 = scmp.lt.s32.totalorder %s148_s18, %s148_s18 }
  0x13   :  { %p155_p8 = por %p154_p7, %p153_p6 }
  0x15   :  { %p156_p9 = pnand %p155_p8, %p149_p5 }
  0x17   :  { %159 = shalt.err (!%p156_p9)
}
  0x18   :  { %33 = dma.hbm_to_vmem [thread:$0]  %s216_s1, 256, %s28_s17, [#allocation7], %s187_s12, %s187_s12, %s188_s13  }
  0x19   :  { %180 = dma.done.wait [#allocation4], 256  }
  0x1a   :  { %181 = vsyncadd [#allocation4], 4294967040 }
  0x1b   :  { %182 = dma.done.wait [#allocation7], 256  }
  0x1c   :  { %183 = vsyncadd [#allocation7], 4294967040  ;;  %v46_v0 = vld [vmem:[#allocation3] sm:$0xff]  ;;  %v47_v1 = vld [vmem:[#allocation3 + $0x8] sm:$0xff]  ;;  %s190_s0 = smov [#allocation8]   ;;  %vm93_vm0 = vcmask 0  }
  0x1d   :  { %v50_v2 = vsub.f32 0.9, %v46_v0  ;;  %v51_v3 = vsub.f32 0.9, %v47_v1  ;;  %v111_v4 = vadd.f32 -0.1, %v46_v0 }
  0x1e   :  { %v112_v5 = vadd.f32 -0.1, %v47_v1  ;;  %v48_v16 = vld [vmem:[#allocation6] sm:$0xff]  ;;  %v49_v17 = vld [vmem:[#allocation6 + $0x8] sm:$0xff]  ;;  %s101_s1 = sshll.u32 %s190_s0, 4  ;;  %s102_s1 = int_to_ptr.vmem [resolvable:$true] %s101_s1 }
  0x1f   :  { %v52_v6 = vmax.f32 %v50_v2, 0.0  ;;  %v53_v7 = vmax.f32 %v51_v3, 0.0  ;;  %v58_v8 = vmax.f32 %v111_v4, 0.0  ;;  %s160_s22 = scalar_lea.vmem %s102_s1, 16  ;;  %s164_s23 = scalar_lea.vmem %s102_s1, 32 }
  0x20   :  { %v59_v9 = vmax.f32 %v112_v5, 0.0  ;;  %p161_p10 = scmp.ne.s32.totalorder %s102_s1, %s160_s22  ;;  %p165_p11 = scmp.lt.s32.totalorder %s102_s1, %s102_s1 }
  0x21   :  { %v54_v10 = vmul.f32 %v52_v6, %v52_v6  ;;  %v55_v11 = vmul.f32 %v53_v7, %v53_v7  ;;  %v60_v12 = vmul.f32 %v58_v8, %v58_v8  ;;  %p166_p12 = scmp.lt.s32.totalorder %s164_s23, %s160_s22 }
  0x22   :  { %v61_v13 = vmul.f32 %v59_v9, %v59_v9 }
  0x23   :  { %v62_v14 = vmul.f32 0.5, %v60_v12  ;;  %p167_p13 = por %p166_p12, %p165_p11 }
  0x24   :  { %v63_v15 = vmul.f32 0.5, %v61_v13 }
  0x25   :  { %v64_v18 = vsub.f32 %v54_v10, %v62_v14  ;;  %p168_p0 = pnand %p167_p13, %p161_p10 }
  0x26   :  { %v65_v19 = vsub.f32 %v55_v11, %v63_v15 }
  0x27   :  { %v66_v20 = vmul.f32 %v64_v18, %v48_v16 }
  0x28   :  { %v67_v21 = vmul.f32 %v65_v19, %v49_v17 }
  0x29   :  { %v68_v22 = vadd.f32 %v66_v20, %v62_v14 }
  0x2a   :  { %v69_v23 = vadd.f32 %v67_v21, %v63_v15 }
  0x2c   :  { %v81_v24 = vadd.f32 %v69_v23, %v68_v22 }
  0x2e   :  { %82 = vadd.xlane.f32.xlu0 %v81_v24 }
  0xb7   :  { %v83_v25 = vpop.xlane.xlu0 %82 }
  0xb8   :  { %v84_v26 = vrot.slane %v83_v25, 4 }
  0xba   :  { %v85_v27 = vadd.f32 %v84_v26, %v83_v25 }
  0xbc   :  { %v86_v28 = vrot.slane %v85_v27, 2 }
  0xbe   :  { %v87_v29 = vadd.f32 %v86_v28, %v85_v27 }
  0xc0   :  { %v88_v30 = vrot.slane %v87_v29, 1 }
  0xc2   :  { %v89_v31 = vadd.f32 %v88_v30, %v87_v29 }
  0xc4   :  { %113 = vpush %v89_v31 }
  0xf5   :  { %s114_s21 = spop %113 }
  0xf6   :  { %v91_v32 = vstv %s114_s21 }
  0xf7   :  { %v92_v33 = vmul.f32 0.00048828125, %v91_v32 }
  0xf9   :  { %94 = vst.msk [vmem:[#allocation8] sm:$0x1] %vm93_vm0, %v92_v33 }
  0xfa   :  { %171 = shalt.err (!%p168_p0)
}
  0xfb   :  { %104 = dma.vmem_to_hbm [thread:$0]  %s102_s1, 16, %s217_s2, [#allocation5]  }
  0xfc   :  { %184 = dma.done.wait [#allocation5], 16  }
  0xfd   :  { %185 = vsyncadd [#allocation5], 4294967280 }
  0xfe   :  { %108 = vsyncpa [#allocation4], 1 }
  0xff   :  { %109 = vsyncpa [#allocation7], 1 }
 0x100   :  { %110 = vsyncpa [#allocation5], 1 }

</bundles_post_ra>
